<compile_context>
chip_gen: v5e
topology: v5e:2x2
jax: 0.10.0
libtpu: 0.0.40
codegen_flags: <defaults>
</compile_context>

<pallas_src>
import functools

import jax
import jax.numpy as jnp
from jax import lax
from jax.experimental import pallas as pl
from jax.experimental.pallas import tpu as pltpu

ALPHA = 0.1


def _round_up(x, m):
    return (x + m - 1) // m * m


def _smooth_ce_kernel(logits_ref, labels_ref, out_ref,
                      m_sc, l_sc, rsum_sc, xlab_sc,
                      *, alpha, n_valid_rows, n_valid_cols):
    # logits_ref: (tb, tc) native dtype; labels_ref: (tb, 1) i32;
    # out_ref: (tb, 1) f32 per-row loss (resident across the class axis).
    i = pl.program_id(0)                     # grid reads at kernel top level
    j = pl.program_id(1)                     # (NOT inside pl.when bodies)
    n_j = pl.num_programs(1)
    tb, tc = logits_ref.shape

    @pl.when(j == 0)
    def _():
        m_sc[...] = jnp.full_like(m_sc, -jnp.inf)   # running max
        l_sc[...] = jnp.zeros_like(l_sc)            # running sum(exp(x - m))
        rsum_sc[...] = jnp.zeros_like(rsum_sc)      # running sum_c x
        xlab_sc[...] = jnp.zeros_like(xlab_sc)      # running x[label]

    x = logits_ref[...].astype(jnp.float32)                         # (tb, tc)
    labels = labels_ref[...]                                        # (tb, 1) i32

    col = lax.broadcasted_iota(jnp.int32, (tb, tc), 1) + j * tc     # global col ids
    col_valid = col < n_valid_cols

    # Row validity mask, computed OUTSIDE the pl.when (uses program_id).
    row = lax.broadcasted_iota(jnp.int32, (tb, 1), 0) + i * tb
    row_valid = row < n_valid_rows

    # --- online logsumexp over class tiles (padded cols -> -inf) ---
    x_lse = jnp.where(col_valid, x, -jnp.inf)
    m_prev = m_sc[...]
    m_new = jnp.maximum(m_prev, jnp.max(x_lse, axis=-1, keepdims=True))
    scale = jnp.exp(m_prev - m_new)
    p = jnp.exp(x_lse - m_new)
    l_sc[...] = l_sc[...] * scale + jnp.sum(p, axis=-1, keepdims=True)
    m_sc[...] = m_new

    # --- running row sum (for the alpha/C term) and x at the label ---
    rsum_sc[...] = rsum_sc[...] + jnp.sum(
        jnp.where(col_valid, x, 0.0), axis=-1, keepdims=True)
    xlab_sc[...] = xlab_sc[...] + jnp.sum(
        jnp.where(col == labels, x, 0.0), axis=-1, keepdims=True)

    @pl.when(j == n_j - 1)
    def _():
        lse = m_sc[...] + jnp.log(l_sc[...])
        loss = (lse
                - (1.0 - alpha) * xlab_sc[...]
                - (alpha / n_valid_cols) * rsum_sc[...])            # (tb, 1)
        out_ref[...] = jnp.where(row_valid, loss, 0.0)


def smooth_cross_entropy(logits, labels, alpha=ALPHA, tb=256, tc=2048):
    """logits: (B, C) float (any dtype), labels: (B,) int. Returns scalar f32 mean loss."""
    B, C = logits.shape

    # Lane/sublane-aligned tiles, capped at the array extent.
    tb = min(tb, _round_up(B, 8))
    tc = min(tc, _round_up(C, 128))
    Bp = _round_up(B, tb)
    Cp = _round_up(C, tc)

    if (Bp, Cp) != (B, C):
        logits = jnp.pad(logits, ((0, Bp - B), (0, Cp - C)))
    labels_2d = labels.astype(jnp.int32).reshape(B, 1)
    if Bp != B:
        labels_2d = jnp.pad(labels_2d, ((0, Bp - B), (0, 0)))

    kernel = functools.partial(
        _smooth_ce_kernel, alpha=float(alpha),
        n_valid_rows=B, n_valid_cols=C)

    per_row = pl.pallas_call(
        kernel,
        out_shape=jax.ShapeDtypeStruct((Bp, 1), jnp.float32),
        grid_spec=pltpu.PrefetchScalarGridSpec(
            num_scalar_prefetch=0,
            grid=(Bp // tb, Cp // tc),
            in_specs=[
                pl.BlockSpec((tb, tc), lambda i, j: (i, j)),   # logits (native dtype)
                pl.BlockSpec((tb, 1), lambda i, j: (i, 0)),    # labels
            ],
            out_specs=pl.BlockSpec((tb, 1), lambda i, j: (i, 0)),
            scratch_shapes=[
                pltpu.VMEM((tb, 1), jnp.float32),  # running max
                pltpu.VMEM((tb, 1), jnp.float32),  # running sum exp
                pltpu.VMEM((tb, 1), jnp.float32),  # running row sum
                pltpu.VMEM((tb, 1), jnp.float32),  # x at label
            ],
        ),
        compiler_params=pltpu.CompilerParams(
            dimension_semantics=("parallel", "arbitrary"),
        ),
    )(logits, labels_2d)

    # Finalize with the TRUE batch size (padded rows contribute 0).
    return jnp.sum(per_row[:, 0]) / jnp.float32(B)


def _reference(logits, labels, alpha=ALPHA):
    num_classes = logits.shape[-1]
    one_hot = jax.nn.one_hot(labels, num_classes, dtype=jnp.float32)
    target_probs = one_hot * (1.0 - alpha) + alpha / num_classes
    log_probs = jax.nn.log_softmax(logits.astype(jnp.float32), axis=-1)
    loss = -(target_probs * log_probs).sum(axis=-1)
    return loss.mean()


if __name__ == "__main__":
    key = jax.random.PRNGKey(0)
    k1, k2, k3, k4 = jax.random.split(key, 4)

    # Small f32 case (single tile, padded classes 32 -> 128).
    B, C = 8, 32
    logits = jax.random.normal(k1, (B, C), dtype=jnp.float32)
    labels = jax.random.randint(k2, (B,), 0, C, dtype=jnp.int32)
    loss = smooth_cross_entropy(logits, labels)
    jax.block_until_ready(loss)
    ref = _reference(logits, labels)
    assert jnp.allclose(loss, ref, atol=1e-5, rtol=1e-5), (loss, ref)

    # bf16 case with ragged shapes -> exercises batch padding, multiple class
    # tiles (tc=128), online-lse accumulation and column/row masking.
    B2, C2 = 20, 300
    logits2 = jax.random.normal(k3, (B2, C2), dtype=jnp.float32).astype(jnp.bfloat16)
    labels2 = jax.random.randint(k4, (B2,), 0, C2, dtype=jnp.int32)
    loss2 = smooth_cross_entropy(logits2, labels2, tc=128)
    jax.block_until_ready(loss2)
    ref2 = _reference(logits2, labels2)
    assert jnp.allclose(loss2, ref2, atol=1e-4, rtol=1e-4), (loss2, ref2)

    print("KERNEL_OK")
</pallas_src>

<mosaic_0001>
module attributes {stable_mosaic.version = 11 : i64} {
  func.func @_smooth_ce_kernel(%arg0: i32, %arg1: i32, %arg2: memref<8x128xf32, #tpu.memory_space<vmem>>, %arg3: memref<8x1xi32, #tpu.memory_space<vmem>>, %arg4: memref<8x1xf32, #tpu.memory_space<vmem>>, %arg5: memref<8x1xf32, #tpu.memory_space<vmem>>, %arg6: memref<8x1xf32, #tpu.memory_space<vmem>>, %arg7: memref<8x1xf32, #tpu.memory_space<vmem>>, %arg8: memref<8x1xf32, #tpu.memory_space<vmem>>) attributes {dimension_semantics = [#tpu.dimension_semantics<parallel>, #tpu.dimension_semantics<arbitrary>], iteration_bounds = array<i64: 1, 1>, scalar_prefetch = 0 : i64, scratch_operands = 4 : i64, tpu.core_type = #tpu.core_type<tc>, window_params = [{transform_indices = @transform_0, window_bounds = array<i64: 8, 128>}, {transform_indices = @transform_1, window_bounds = array<i64: 8, 1>}, {transform_indices = @transform_2, window_bounds = array<i64: 8, 1>}]} {
    %c0_i32 = arith.constant 0 : i32
    %0 = arith.cmpi eq, %arg1, %c0_i32 : i32
    %1 = arith.extui %0 : i1 to i32
    %c0_i32_0 = arith.constant 0 : i32
    %2 = arith.cmpi ne, %1, %c0_i32_0 : i32
    scf.if %2 {
      %cst_29 = arith.constant 0xFF800000 : f32
      %54 = vector.broadcast %cst_29 : f32 to vector<8x1xf32>
      %c0_30 = arith.constant 0 : index
      %c0_31 = arith.constant 0 : index
      %55 = vector.load %arg5[%c0_30, %c0_31] : memref<8x1xf32, #tpu.memory_space<vmem>>, vector<8x1xf32>
      tpu.vector_store %arg5[%c0_30, %c0_31], %54 {strides = array<i32>} : memref<8x1xf32, #tpu.memory_space<vmem>>, vector<8x1xf32>,
      %cst_32 = arith.constant 0.000000e+00 : f32
      %56 = vector.broadcast %cst_32 : f32 to vector<8x1xf32>
      %c0_33 = arith.constant 0 : index
      %c0_34 = arith.constant 0 : index
      %57 = vector.load %arg6[%c0_33, %c0_34] : memref<8x1xf32, #tpu.memory_space<vmem>>, vector<8x1xf32>
      tpu.vector_store %arg6[%c0_33, %c0_34], %56 {strides = array<i32>} : memref<8x1xf32, #tpu.memory_space<vmem>>, vector<8x1xf32>,
      %cst_35 = arith.constant 0.000000e+00 : f32
      %58 = vector.broadcast %cst_35 : f32 to vector<8x1xf32>
      %c0_36 = arith.constant 0 : index
      %c0_37 = arith.constant 0 : index
      %59 = vector.load %arg7[%c0_36, %c0_37] : memref<8x1xf32, #tpu.memory_space<vmem>>, vector<8x1xf32>
      tpu.vector_store %arg7[%c0_36, %c0_37], %58 {strides = array<i32>} : memref<8x1xf32, #tpu.memory_space<vmem>>, vector<8x1xf32>,
      %cst_38 = arith.constant 0.000000e+00 : f32
      %60 = vector.broadcast %cst_38 : f32 to vector<8x1xf32>
      %c0_39 = arith.constant 0 : index
      %c0_40 = arith.constant 0 : index
      %61 = vector.load %arg8[%c0_39, %c0_40] : memref<8x1xf32, #tpu.memory_space<vmem>>, vector<8x1xf32>
      tpu.vector_store %arg8[%c0_39, %c0_40], %60 {strides = array<i32>} : memref<8x1xf32, #tpu.memory_space<vmem>>, vector<8x1xf32>,
    } else {
    }
    %c0 = arith.constant 0 : index
    %c0_1 = arith.constant 0 : index
    %3 = vector.load %arg2[%c0, %c0_1] : memref<8x128xf32, #tpu.memory_space<vmem>>, vector<8x128xf32>
    %c0_2 = arith.constant 0 : index
    %c0_3 = arith.constant 0 : index
    %4 = vector.load %arg3[%c0_2, %c0_3] : memref<8x1xi32, #tpu.memory_space<vmem>>, vector<8x1xi32>
    %5 = tpu.iota {dimensions = array<i32: 1>} : vector<8x128xi32>
    %c128_i32 = arith.constant 128 : i32
    %6 = arith.muli %arg1, %c128_i32 : i32
    %7 = vector.broadcast %6 : i32 to vector<8x128xi32>
    %8 = arith.addi %5, %7 : vector<8x128xi32>
    %c32_i32 = arith.constant 32 : i32
    %9 = vector.broadcast %c32_i32 : i32 to vector<8x128xi32>
    %10 = arith.cmpi slt, %8, %9 : vector<8x128xi32>
    %11 = tpu.iota {dimensions = array<i32: 0>} : vector<8x1xi32>
    %c8_i32 = arith.constant 8 : i32
    %12 = arith.muli %arg0, %c8_i32 : i32
    %13 = vector.broadcast %12 : i32 to vector<8x1xi32>
    %14 = arith.addi %11, %13 : vector<8x1xi32>
    %c8_i32_4 = arith.constant 8 : i32
    %15 = vector.broadcast %c8_i32_4 : i32 to vector<8x1xi32>
    %16 = arith.cmpi slt, %14, %15 : vector<8x1xi32>
    %cst = arith.constant 0xFF800000 : f32
    %17 = vector.broadcast %cst : f32 to vector<8x128xf32>
    %18 = arith.select %10, %3, %17 : vector<8x128xi1>, vector<8x128xf32>
    %c0_5 = arith.constant 0 : index
    %c0_6 = arith.constant 0 : index
    %19 = vector.load %arg5[%c0_5, %c0_6] : memref<8x1xf32, #tpu.memory_space<vmem>>, vector<8x1xf32>
    %cst_7 = arith.constant dense<0xFF800000> : vector<8xf32>
    %20 = vector.multi_reduction <maximumf>, %18, %cst_7 [1] : vector<8x128xf32> to vector<8xf32>
    %21 = vector.shape_cast %20 : vector<8xf32> to vector<8x1xf32>
    %22 = arith.maximumf %19, %21 : vector<8x1xf32>
    %23 = arith.subf %19, %22 : vector<8x1xf32>
    %24 = math.exp %23 : vector<8x1xf32>
    %25 = vector.broadcast %22 : vector<8x1xf32> to vector<8x128xf32>
    %26 = arith.subf %18, %25 : vector<8x128xf32>
    %27 = math.exp %26 : vector<8x128xf32>
    %c0_8 = arith.constant 0 : index
    %c0_9 = arith.constant 0 : index
    %28 = vector.load %arg6[%c0_8, %c0_9] : memref<8x1xf32, #tpu.memory_space<vmem>>, vector<8x1xf32>
    %29 = arith.mulf %28, %24 : vector<8x1xf32>
    %cst_10 = arith.constant dense<0.000000e+00> : vector<8xf32>
    %30 = vector.multi_reduction <add>, %27, %cst_10 [1] : vector<8x128xf32> to vector<8xf32>
    %31 = vector.shape_cast %30 : vector<8xf32> to vector<8x1xf32>
    %32 = arith.addf %29, %31 : vector<8x1xf32>
    %c0_11 = arith.constant 0 : index
    %c0_12 = arith.constant 0 : index
    %33 = vector.load %arg6[%c0_11, %c0_12] : memref<8x1xf32, #tpu.memory_space<vmem>>, vector<8x1xf32>
    tpu.vector_store %arg6[%c0_11, %c0_12], %32 {strides = array<i32>} : memref<8x1xf32, #tpu.memory_space<vmem>>, vector<8x1xf32>,
    %c0_13 = arith.constant 0 : index
    %c0_14 = arith.constant 0 : index
    %34 = vector.load %arg5[%c0_13, %c0_14] : memref<8x1xf32, #tpu.memory_space<vmem>>, vector<8x1xf32>
    tpu.vector_store %arg5[%c0_13, %c0_14], %22 {strides = array<i32>} : memref<8x1xf32, #tpu.memory_space<vmem>>, vector<8x1xf32>,
    %c0_15 = arith.constant 0 : index
    %c0_16 = arith.constant 0 : index
    %35 = vector.load %arg7[%c0_15, %c0_16] : memref<8x1xf32, #tpu.memory_space<vmem>>, vector<8x1xf32>
    %cst_17 = arith.constant 0.000000e+00 : f32
    %36 = vector.broadcast %cst_17 : f32 to vector<8x128xf32>
    %37 = arith.select %10, %3, %36 : vector<8x128xi1>, vector<8x128xf32>
    %cst_18 = arith.constant dense<0.000000e+00> : vector<8xf32>
    %38 = vector.multi_reduction <add>, %37, %cst_18 [1] : vector<8x128xf32> to vector<8xf32>
    %39 = vector.shape_cast %38 : vector<8xf32> to vector<8x1xf32>
    %40 = arith.addf %35, %39 : vector<8x1xf32>
    %c0_19 = arith.constant 0 : index
    %c0_20 = arith.constant 0 : index
    %41 = vector.load %arg7[%c0_19, %c0_20] : memref<8x1xf32, #tpu.memory_space<vmem>>, vector<8x1xf32>
    tpu.vector_store %arg7[%c0_19, %c0_20], %40 {strides = array<i32>} : memref<8x1xf32, #tpu.memory_space<vmem>>, vector<8x1xf32>,
    %c0_21 = arith.constant 0 : index
    %c0_22 = arith.constant 0 : index
    %42 = vector.load %arg8[%c0_21, %c0_22] : memref<8x1xf32, #tpu.memory_space<vmem>>, vector<8x1xf32>
    %43 = vector.broadcast %4 : vector<8x1xi32> to vector<8x128xi32>
    %44 = arith.cmpi eq, %8, %43 : vector<8x128xi32>
    %cst_23 = arith.constant 0.000000e+00 : f32
    %45 = vector.broadcast %cst_23 : f32 to vector<8x128xf32>
    %46 = arith.select %44, %3, %45 : vector<8x128xi1>, vector<8x128xf32>
    %cst_24 = arith.constant dense<0.000000e+00> : vector<8xf32>
    %47 = vector.multi_reduction <add>, %46, %cst_24 [1] : vector<8x128xf32> to vector<8xf32>
    %48 = vector.shape_cast %47 : vector<8xf32> to vector<8x1xf32>
    %49 = arith.addf %42, %48 : vector<8x1xf32>
    %c0_25 = arith.constant 0 : index
    %c0_26 = arith.constant 0 : index
    %50 = vector.load %arg8[%c0_25, %c0_26] : memref<8x1xf32, #tpu.memory_space<vmem>>, vector<8x1xf32>
    tpu.vector_store %arg8[%c0_25, %c0_26], %49 {strides = array<i32>} : memref<8x1xf32, #tpu.memory_space<vmem>>, vector<8x1xf32>,
    %c0_i32_27 = arith.constant 0 : i32
    %51 = arith.cmpi eq, %arg1, %c0_i32_27 : i32
    %52 = arith.extui %51 : i1 to i32
    %c0_i32_28 = arith.constant 0 : i32
    %53 = arith.cmpi ne, %52, %c0_i32_28 : i32
    scf.if %53 {
      %c0_29 = arith.constant 0 : index
      %c0_30 = arith.constant 0 : index
      %54 = vector.load %arg5[%c0_29, %c0_30] : memref<8x1xf32, #tpu.memory_space<vmem>>, vector<8x1xf32>
      %c0_31 = arith.constant 0 : index
      %c0_32 = arith.constant 0 : index
      %55 = vector.load %arg6[%c0_31, %c0_32] : memref<8x1xf32, #tpu.memory_space<vmem>>, vector<8x1xf32>
      %56 = math.log %55 : vector<8x1xf32>
      %57 = arith.addf %54, %56 : vector<8x1xf32>
      %c0_33 = arith.constant 0 : index
      %c0_34 = arith.constant 0 : index
      %58 = vector.load %arg8[%c0_33, %c0_34] : memref<8x1xf32, #tpu.memory_space<vmem>>, vector<8x1xf32>
      %cst_35 = arith.constant 0.899999976 : f32
      %59 = vector.broadcast %cst_35 : f32 to vector<8x1xf32>
      %60 = arith.mulf %59, %58 : vector<8x1xf32>
      %61 = arith.subf %57, %60 : vector<8x1xf32>
      %c0_36 = arith.constant 0 : index
      %c0_37 = arith.constant 0 : index
      %62 = vector.load %arg7[%c0_36, %c0_37] : memref<8x1xf32, #tpu.memory_space<vmem>>, vector<8x1xf32>
      %cst_38 = arith.constant 3.125000e-03 : f32
      %63 = vector.broadcast %cst_38 : f32 to vector<8x1xf32>
      %64 = arith.mulf %63, %62 : vector<8x1xf32>
      %65 = arith.subf %61, %64 : vector<8x1xf32>
      %cst_39 = arith.constant 0.000000e+00 : f32
      %66 = vector.broadcast %cst_39 : f32 to vector<8x1xf32>
      %67 = arith.select %16, %65, %66 : vector<8x1xi1>, vector<8x1xf32>
      %c0_40 = arith.constant 0 : index
      %c0_41 = arith.constant 0 : index
      %68 = vector.load %arg4[%c0_40, %c0_41] : memref<8x1xf32, #tpu.memory_space<vmem>>, vector<8x1xf32>
      tpu.vector_store %arg4[%c0_40, %c0_41], %67 {strides = array<i32>} : memref<8x1xf32, #tpu.memory_space<vmem>>, vector<8x1xf32>,
    } else {
    }
    return
  }
  func.func @transform_0(%arg0: i32, %arg1: i32) -> (i32, i32) {
    %c0_i32 = arith.constant 0 : i32
    return %arg0, %arg1 : i32, i32
  }
  func.func @transform_1(%arg0: i32, %arg1: i32) -> (i32, i32) {
    %c0_i32 = arith.constant 0 : i32
    %c0_i32_0 = arith.constant 0 : i32
    return %arg0, %c0_i32 : i32, i32
  }
  func.func @transform_2(%arg0: i32, %arg1: i32) -> (i32, i32) {
    %c0_i32 = arith.constant 0 : i32
    %c0_i32_0 = arith.constant 0 : i32
    return %arg0, %c0_i32 : i32, i32
  }
}

</mosaic_0001>

<bundles_post_ra>
// kernel: tpu_custom_call.1
= control target key start
LH: loop header
LB: loop body
LE: loop exit
PB: predicated region body
PF: predicated region fallthrough
CT: control target
= control target key end

     0   :  { %v22_v0 = vlaneseq  ;;  %vm15_vm0 = vcmask 7168   ;;  %v105_v1 = vmov -inf   ;;  %v106_v5 = vmov 0   ;;  %s143_s0 = inlined_call_operand.vmem [shape: f32[8,128], index: 0, kind: input, shape index: {}]   ;;  %s144_s1 = inlined_call_operand.vmem [shape: s32[8,1], index: 1, kind: input, shape index: {}]   ;;  %s145_s2 = inlined_call_operand.vmem [shape: f32[8,1], index: 2, kind: output, shape index: {}]  }
   0x1   :  { %16 = vst.msk [vmem:[#allocation2] sm:$0xff] %vm15_vm0, %v105_v1  ;;  %v20_v2 = vld [vmem:[%s143_s0] sm:$0xff]  ;;  %97 = vset.pattern.permute.xlu0 %v106_v5  ;;  %98 = vset.pattern.permute.xlu1 %v106_v5  ;;  %v107_v6 = vmov 0.0  }
   0x2   :  { %v23_v3 = vand.u32 127, %v22_v0  ;;  %17 = vst.msk [vmem:[#allocation3] sm:$0xff] %vm15_vm0, %v107_v6  ;;  %v21_v7 = vld [vmem:[%s144_s1] sm:$0xff] }
   0x3   :  { %18 = vst.msk [vmem:[#allocation4] sm:$0xff] %vm15_vm0, %v107_v6  ;;  %66 = vperm.xlu1 %98, %v21_v7  }
   0x4   :  { %vm27_vm1 = vcmp.lt.s32.totalorder %v23_v3, 32  ;;  %19 = vst.msk [vmem:[#allocation5] sm:$0xff] %vm15_vm0, %v107_v6 }
   0x5   :  { %v34_v4 = vsel %vm27_vm1, %v20_v2, -inf  ;;  %v59_v14 = vsel %vm27_vm1, %v20_v2, 0.0 }
   0x6   :  { %36 = vmax.xlane.f32.xlu0 %v34_v4 }
   0x8   :  { %v35_v8 = vld [vmem:[#allocation2] sm:$0xff] }
   0x9   :  { %v50_v27 = vld [vmem:[#allocation3] sm:$0xff] }
   0xa   :  { %v58_v22 = vld [vmem:[#allocation4] sm:$0xff] }
   0xb   :  { %v64_v19 = vld [vmem:[#allocation5] sm:$0xff] }
  0x75   :  { %v67_v12 = vpop.permute.xlu1 %66 }
  0x76   :  { %vm68_vm2 = vcmp.eq.s32.totalorder %v23_v3, %v67_v12 }
  0x77   :  { %v69_v13 = vsel %vm68_vm2, %v20_v2, 0.0 }
  0x78   :  { %70 = vadd.xlane.f32.xlu2 %v69_v13 }
  0x79   :  { %v37_v9 = vpop.xlane.xlu0 %36 }
  0x7a   :  { %v38_v10 = vmax.f32 %v35_v8, %v37_v9 }
  0x7c   :  { %v39_v11 = vsub.f32 %v35_v8, %v38_v10  ;;  %57 = vst.msk [vmem:[#allocation2] sm:$0xff] %vm15_vm0, %v38_v10  ;;  %44 = vperm.xlu0 %97, %v38_v10  }
  0x7e   :  { %v40_v25 = vmul.f32 1.442695, %v39_v11 }
  0x80   :  { %60 = vadd.xlane.f32.xlu2 %v59_v14 }
  0x83   :  { %v77_v36 = vld [vmem:[#allocation2] sm:$0xff] }
  0xeb   :  { %v71_v20 = vpop.xlane.xlu2 %70 }
  0xec   :  { %v72_v21 = vadd.f32 %v71_v20, %v64_v19 }
  0xee   :  { %v45_v15 = vpop.permute.xlu0 %44  ;;  %73 = vst.msk [vmem:[#allocation5] sm:$0xff] %vm15_vm0, %v72_v21 }
  0xef   :  { %v47_v16 = vsub.f32 %v34_v4, %v45_v15 }
  0xf1   :  { %v48_v17 = vmul.f32 1.442695, %v47_v16 }
  0xf3   :  { %99 = vpow2.f32 %v48_v17  ;;  %v61_v23 = vpop.xlane.xlu2 %60 }
  0xf4   :  { %v62_v24 = vadd.f32 %v61_v23, %v58_v22  ;;  %101 = vpow2.f32 %v40_v25 }
  0xf5   :  { %v82_v33 = vld [vmem:[#allocation5] sm:$0xff] }
  0xf6   :  { %63 = vst.msk [vmem:[#allocation4] sm:$0xff] %vm15_vm0, %v62_v24  ;;  %v83_v38 = vmul.f32 0.9, %v82_v33 }
  0xf9   :  { %v100_v18 = vpop.eup %99 }
  0xfa   :  { %52 = vadd.xlane.f32.xlu1 %v100_v18  ;;  %v102_v26 = vpop.eup %101 }
  0xfb   :  { %v51_v28 = vmul.f32 %v102_v26, %v50_v27 }
  0xfd   :  { %v85_v34 = vld [vmem:[#allocation4] sm:$0xff] }
  0xfe   :  { %v86_v39 = vmul.f32 0.003125, %v85_v34 }
 0x16d   :  { %v53_v29 = vpop.xlane.xlu1 %52 }
 0x16e   :  { %v54_v30 = vadd.f32 %v53_v29, %v51_v28 }
 0x170   :  { %56 = vst.msk [vmem:[#allocation3] sm:$0xff] %vm15_vm0, %v54_v30 }
 0x177   :  { %v78_v31 = vld [vmem:[#allocation3] sm:$0xff] }
 0x178   :  { %103 = vlog2.f32 %v78_v31 }
 0x17e   :  { %v104_v32 = vpop.eup %103 }
 0x17f   :  { %v80_v35 = vmul.f32 0.6931472, %v104_v32 }
 0x181   :  { %v81_v37 = vadd.f32 %v80_v35, %v77_v36 }
 0x183   :  { %v84_v40 = vsub.f32 %v81_v37, %v83_v38 }
 0x185   :  { %v87_v41 = vsub.f32 %v84_v40, %v86_v39 }
 0x187   :  { %89 = vst.msk [vmem:[%s145_s2] sm:$0xff] %vm15_vm0, %v87_v41 }

</bundles_post_ra>
